<compile_context>
chip_gen: v7x
topology: tpu7x:2x2x1
jax: 0.10.0
libtpu: 0.0.40
codegen_flags: <defaults>
</compile_context>

<pallas_src>
from functools import partial

import jax
import jax.numpy as jnp
from jax.experimental import pallas as pl
from jax.experimental.pallas import tpu as pltpu

_VMEM_LIMIT_BYTES = 32 * 1024 * 1024     # safe on v5e/v6e (128 MiB) and v7x (64 MiB phys)
_BLOCK_BYTES_TARGET = 2 * 1024 * 1024    # ~2 MiB per x/y block -> ~8 MiB double-buffered


# ---------------------------------------------------------------------------
# Kernels
# ---------------------------------------------------------------------------
def _ln_lastdim_kernel(x_ref, w_ref, b_ref, o_ref, *, eps):
    """Normalize over the last (lane) axis.  x_ref: (TN, C); w/b: (1, C) f32."""
    x = x_ref[...].astype(jnp.float32)
    mean = jnp.mean(x, axis=-1, keepdims=True)
    xc = x - mean
    var = jnp.mean(xc * xc, axis=-1, keepdims=True)        # biased var (matches torch)
    y = xc * jax.lax.rsqrt(var + eps) * w_ref[...] + b_ref[...]
    o_ref[...] = y.astype(o_ref.dtype)


def _ln_sublane_kernel(x_ref, w_ref, b_ref, o_ref, *, eps):
    """Normalize over the sublane axis (C); lanes carry independent positions.
    x_ref: (C, TS); w/b: (C, 1) f32.  Lane-dense loads/stores for any C."""
    x = x_ref[...].astype(jnp.float32)
    mean = jnp.mean(x, axis=0, keepdims=True)
    xc = x - mean
    var = jnp.mean(xc * xc, axis=0, keepdims=True)
    y = xc * jax.lax.rsqrt(var + eps) * w_ref[...] + b_ref[...]
    o_ref[...] = y.astype(o_ref.dtype)


# ---------------------------------------------------------------------------
# Tile sizing helpers
# ---------------------------------------------------------------------------
def _pick_row_tile(N, C, itemsize):
    """Row tile (multiple of 8) targeting ~_BLOCK_BYTES_TARGET per block."""
    rows = max(8, (_BLOCK_BYTES_TARGET // max(C * itemsize, 1)) // 8 * 8)
    if N >= 16:
        # keep >= 2 grid steps so v7x's two TensorCores both get work
        half = (((N + 1) // 2) + 7) // 8 * 8
        rows = min(rows, half)
    if rows >= N:
        return N            # single full block (full-dim block is always legal)
    return rows             # multiple of 8; ragged last block via pl.cdiv grid


def _pick_lane_tile(S, C, itemsize):
    """Lane tile (multiple of 128) targeting ~_BLOCK_BYTES_TARGET per block."""
    lanes = max(128, (_BLOCK_BYTES_TARGET // max(C * itemsize, 1)) // 128 * 128)
    if lanes >= S:
        return S            # full spatial extent (always legal)
    return lanes            # multiple of 128; ragged last block via pl.cdiv grid


# ---------------------------------------------------------------------------
# Drivers
# ---------------------------------------------------------------------------
def layernorm_channels_last(x, weight, bias, eps):
    C = x.shape[-1]
    orig_shape = x.shape
    x2d = x.reshape(-1, C)
    N = x2d.shape[0]
    itemsize = jnp.dtype(x2d.dtype).itemsize
    tn = _pick_row_tile(N, C, itemsize)
    w2 = weight.reshape(1, C).astype(jnp.float32)
    b2 = bias.reshape(1, C).astype(jnp.float32)
    out = pl.pallas_call(
        partial(_ln_lastdim_kernel, eps=eps),
        out_shape=jax.ShapeDtypeStruct((N, C), x2d.dtype),
        grid_spec=pl.GridSpec(
            grid=(pl.cdiv(N, tn),),
            in_specs=[
                pl.BlockSpec((tn, C), lambda i: (i, 0)),
                pl.BlockSpec((1, C), lambda i: (0, 0)),
                pl.BlockSpec((1, C), lambda i: (0, 0)),
            ],
            out_specs=pl.BlockSpec((tn, C), lambda i: (i, 0)),
        ),
        compiler_params=pltpu.CompilerParams(
            dimension_semantics=("parallel",),
            vmem_limit_bytes=_VMEM_LIMIT_BYTES,
        ),
    )(x2d, w2, b2)
    return out.reshape(orig_shape)


def layernorm_channels_first(x, weight, bias, eps):
    B, C = x.shape[0], x.shape[1]
    S = 1
    for d in x.shape[2:]:
        S *= int(d)
    x3 = x.reshape(B, C, S)                    # free reshape; no HBM transpose
    itemsize = jnp.dtype(x3.dtype).itemsize
    ts = _pick_lane_tile(S, C, itemsize)
    w2 = weight.reshape(C, 1).astype(jnp.float32)
    b2 = bias.reshape(C, 1).astype(jnp.float32)
    out = pl.pallas_call(
        partial(_ln_sublane_kernel, eps=eps),
        out_shape=jax.ShapeDtypeStruct((B, C, S), x3.dtype),
        grid_spec=pl.GridSpec(
            grid=(B, pl.cdiv(S, ts)),
            in_specs=[
                pl.BlockSpec((None, C, ts), lambda b, j: (b, 0, j)),   # squeeze batch dim
                pl.BlockSpec((C, 1), lambda b, j: (0, 0)),
                pl.BlockSpec((C, 1), lambda b, j: (0, 0)),
            ],
            out_specs=pl.BlockSpec((None, C, ts), lambda b, j: (b, 0, j)),
        ),
        compiler_params=pltpu.CompilerParams(
            dimension_semantics=("parallel", "parallel"),
            vmem_limit_bytes=_VMEM_LIMIT_BYTES,
        ),
    )(x3, w2, b2)
    return out.reshape(x.shape)


# ---------------------------------------------------------------------------
# Module wrapper (mirror of UXNet LayerNorm)
# ---------------------------------------------------------------------------
class LayerNormPallas:
    def __init__(self, normalized_shape, eps=1e-6, data_format="channels_last"):
        if data_format not in ("channels_last", "channels_first"):
            raise NotImplementedError
        if isinstance(normalized_shape, (tuple, list)):
            assert len(normalized_shape) == 1
            normalized_shape = normalized_shape[0]
        self.C = int(normalized_shape)
        self.eps = float(eps)
        self.data_format = data_format
        # same init as nn.Parameter(torch.ones/zeros)
        self.weight = jnp.ones((self.C,), dtype=jnp.float32)
        self.bias = jnp.zeros((self.C,), dtype=jnp.float32)

    def __call__(self, x):
        if self.data_format == "channels_last":
            assert x.shape[-1] == self.C
            return layernorm_channels_last(x, self.weight, self.bias, self.eps)
        else:
            assert x.shape[1] == self.C
            return layernorm_channels_first(x, self.weight, self.bias, self.eps)


# ---------------------------------------------------------------------------
# References
# ---------------------------------------------------------------------------
def _ref_channels_last(x, w, b, eps):
    mean = jnp.mean(x, axis=-1, keepdims=True)
    var = jnp.mean((x - mean) ** 2, axis=-1, keepdims=True)
    return (x - mean) / jnp.sqrt(var + eps) * w + b


def _ref_channels_first(x, w, b, eps):
    u = jnp.mean(x, axis=1, keepdims=True)
    s = jnp.mean((x - u) ** 2, axis=1, keepdims=True)
    xn = (x - u) / jnp.sqrt(s + eps)
    bshape = (1, x.shape[1]) + (1,) * (x.ndim - 2)
    return w.reshape(bshape) * xn + b.reshape(bshape)


if __name__ == "__main__":
    key = jax.random.PRNGKey(0)
    k1, k2 = jax.random.split(key)

    C = 32
    eps = 1e-6

    # channels_last: (B, H, W, C)
    x_last = jax.random.normal(k1, (2, 16, 16, C), dtype=jnp.float32)
    ln_last = LayerNormPallas(C, eps=eps, data_format="channels_last")
    # non-trivial affine to exercise weight/bias paths
    ln_last.weight = ln_last.weight * 1.5
    ln_last.bias = ln_last.bias + 0.25
    y_last = jax.block_until_ready(ln_last(x_last))
    y_last_ref = _ref_channels_last(x_last, ln_last.weight, ln_last.bias, eps)
    assert jnp.allclose(y_last, y_last_ref, atol=1e-5, rtol=1e-5)

    # channels_first: (B, C, D, H, W) -- as used by the 3D UXNet
    x_first = jax.random.normal(k2, (2, C, 4, 8, 8), dtype=jnp.float32)
    ln_first = LayerNormPallas(C, eps=eps, data_format="channels_first")
    ln_first.weight = ln_first.weight * 0.75
    ln_first.bias = ln_first.bias - 0.1
    y_first = jax.block_until_ready(ln_first(x_first))
    y_first_ref = _ref_channels_first(x_first, ln_first.weight, ln_first.bias, eps)
    assert jnp.allclose(y_first, y_first_ref, atol=1e-5, rtol=1e-5)

    print("KERNEL_OK")
</pallas_src>

<mosaic_0001>
module attributes {stable_mosaic.version = 11 : i64} {
  func.func @_ln_lastdim_kernel(%arg0: i32, %arg1: memref<256x32xf32, #tpu.memory_space<vmem>>, %arg2: memref<1x32xf32, #tpu.memory_space<vmem>>, %arg3: memref<1x32xf32, #tpu.memory_space<vmem>>, %arg4: memref<256x32xf32, #tpu.memory_space<vmem>>) attributes {dimension_semantics = [#tpu.dimension_semantics<parallel>], iteration_bounds = array<i64: 2>, scalar_prefetch = 0 : i64, scratch_operands = 0 : i64, tpu.core_type = #tpu.core_type<tc>, window_params = [{transform_indices = @transform_0, window_bounds = array<i64: 256, 32>}, {pipeline_mode = #tpu.pipeline_mode<synchronous>, transform_indices = @transform_1, window_bounds = array<i64: 1, 32>}, {pipeline_mode = #tpu.pipeline_mode<synchronous>, transform_indices = @transform_2, window_bounds = array<i64: 1, 32>}, {transform_indices = @transform_3, window_bounds = array<i64: 256, 32>}]} {
    %c0 = arith.constant 0 : index
    %c0_0 = arith.constant 0 : index
    %0 = vector.load %arg1[%c0, %c0_0] : memref<256x32xf32, #tpu.memory_space<vmem>>, vector<256x32xf32>
    %cst = arith.constant dense<0.000000e+00> : vector<256xf32>
    %1 = vector.multi_reduction <add>, %0, %cst [1] : vector<256x32xf32> to vector<256xf32>
    %2 = vector.shape_cast %1 : vector<256xf32> to vector<256x1xf32>
    %cst_1 = arith.constant 3.200000e+01 : f32
    %3 = vector.broadcast %cst_1 : f32 to vector<256x1xf32>
    %4 = arith.divf %2, %3 : vector<256x1xf32>
    %5 = vector.broadcast %4 : vector<256x1xf32> to vector<256x32xf32>
    %6 = arith.subf %0, %5 : vector<256x32xf32>
    %7 = arith.mulf %6, %6 : vector<256x32xf32>
    %cst_2 = arith.constant dense<0.000000e+00> : vector<256xf32>
    %8 = vector.multi_reduction <add>, %7, %cst_2 [1] : vector<256x32xf32> to vector<256xf32>
    %9 = vector.shape_cast %8 : vector<256xf32> to vector<256x1xf32>
    %cst_3 = arith.constant 3.200000e+01 : f32
    %10 = vector.broadcast %cst_3 : f32 to vector<256x1xf32>
    %11 = arith.divf %9, %10 : vector<256x1xf32>
    %cst_4 = arith.constant 9.99999997E-7 : f32
    %12 = vector.broadcast %cst_4 : f32 to vector<256x1xf32>
    %13 = arith.addf %11, %12 : vector<256x1xf32>
    %14 = math.rsqrt %13 : vector<256x1xf32>
    %15 = vector.broadcast %14 : vector<256x1xf32> to vector<256x32xf32>
    %16 = arith.mulf %6, %15 : vector<256x32xf32>
    %c0_5 = arith.constant 0 : index
    %c0_6 = arith.constant 0 : index
    %17 = vector.load %arg2[%c0_5, %c0_6] : memref<1x32xf32, #tpu.memory_space<vmem>>, vector<1x32xf32>
    %18 = vector.broadcast %17 : vector<1x32xf32> to vector<256x32xf32>
    %19 = arith.mulf %16, %18 : vector<256x32xf32>
    %c0_7 = arith.constant 0 : index
    %c0_8 = arith.constant 0 : index
    %20 = vector.load %arg3[%c0_7, %c0_8] : memref<1x32xf32, #tpu.memory_space<vmem>>, vector<1x32xf32>
    %21 = vector.broadcast %20 : vector<1x32xf32> to vector<256x32xf32>
    %22 = arith.addf %19, %21 : vector<256x32xf32>
    %c0_9 = arith.constant 0 : index
    %c0_10 = arith.constant 0 : index
    %23 = vector.load %arg4[%c0_9, %c0_10] : memref<256x32xf32, #tpu.memory_space<vmem>>, vector<256x32xf32>
    tpu.vector_store %arg4[%c0_9, %c0_10], %22 {strides = array<i32>} : memref<256x32xf32, #tpu.memory_space<vmem>>, vector<256x32xf32>,
    return
  }
  func.func @transform_0(%arg0: i32) -> (i32, i32) {
    %c0_i32 = arith.constant 0 : i32
    %c0_i32_0 = arith.constant 0 : i32
    return %arg0, %c0_i32 : i32, i32
  }
  func.func @transform_1(%arg0: i32) -> (i32, i32) {
    %c0_i32 = arith.constant 0 : i32
    %c0_i32_0 = arith.constant 0 : i32
    %c0_i32_1 = arith.constant 0 : i32
    return %c0_i32, %c0_i32_0 : i32, i32
  }
  func.func @transform_2(%arg0: i32) -> (i32, i32) {
    %c0_i32 = arith.constant 0 : i32
    %c0_i32_0 = arith.constant 0 : i32
    %c0_i32_1 = arith.constant 0 : i32
    return %c0_i32, %c0_i32_0 : i32, i32
  }
  func.func @transform_3(%arg0: i32) -> (i32, i32) {
    %c0_i32 = arith.constant 0 : i32
    %c0_i32_0 = arith.constant 0 : i32
    return %arg0, %c0_i32 : i32, i32
  }
}

</mosaic_0001>

<bundles_post_ra>
// kernel: tpu_custom_call.1
= control target key start
LH: loop header
LB: loop body
LE: loop exit
PB: predicated region body
PF: predicated region fallthrough
CT: control target
= control target key end

     0   :  { %s903_s12 = smov 0   ;;  %s1453_s0 = inlined_call_operand.vmem [shape: f32[512,32], index: 0, kind: input, shape index: {}]   ;;  %s1454_s1 = inlined_call_operand.vmem [shape: f32[1,32], index: 1, kind: input, shape index: {}]   ;;  %s1455_s2 = inlined_call_operand.vmem [shape: f32[1,32], index: 2, kind: input, shape index: {}]   ;;  %s1456_s3 = inlined_call_operand.vmem [shape: f32[512,32], index: 3, kind: output, shape index: {}]  }
   0x1 LB: > { %s790_s13 = sadd.s32 4294967295, %s881_s12   ;;  %p794_p0 = scmp.ge.s32.totalorder %s881_s12, 1  ;;  %s881_s12 = sphi %s903_s12, %s13_s12  }
   0x2   : > { %p138_p1 = scmp.lt.s32.totalorder %s881_s12, 3 }
   0x4   : > { %p139_p2 = pnand %p794_p0, %p138_p1 }
   0x5   : > { %s795_s14 = sshll.u32 (!%p139_p2), %s790_s13, 5  ;;  %vm206_vm0 = vcmask (!%p139_p2), 261120  }
   0x6   : > { %142 = sbr.rel (%p139_p2) target bundleno = 395 (0x18b), region = 32  ;;  %p163_p3 = scmp.lt.s32.totalorder (!%p139_p2), %s795_s14, 63 }
   0xd   : > { %s1458_s14 = smov (!%p163_p3, %s795_s14), 63 }
   0xe   : > { %s796_s15 = sshll.u32 %s1458_s14, 3 }
   0xf   : > { %s919_s18 = scalar_lea.vmem %s1453_s0, %s796_s15  ;;  %s1290_s25 = scalar_lea.vmem %s1456_s3, %s796_s15 }
  0x10   : > { %v922_v0 = vld [vmem:[%s919_s18] sm:$0xff]  ;;  %v925_v1 = vld [vmem:[%s919_s18 + $0x10] sm:$0xff]  ;;  %v928_v2 = vld [vmem:[%s919_s18 + $0x8] sm:$0xff] }
  0x11   : > { %v207_v3 = vsel %vm206_vm0, %v922_v0, 0.0  ;;  %v213_v4 = vsel %vm206_vm0, %v925_v1, 0.0  ;;  %v935_v5 = vld [vmem:[%s919_s18 + $0x18] sm:$0xff]  ;;  %v210_v6 = vsel %vm206_vm0, %v928_v2, 0.0  ;;  %v942_v8 = vld [vmem:[%s919_s18 + $0x20] sm:$0xff]  ;;  %v945_v9 = vld [vmem:[%s919_s18 + $0x28] sm:$0xff] }
  0x12   : > { %208 = vadd.xlane.f32.xlu0 %v207_v3  ;;  %214 = vadd.xlane.f32.xlu1 %v213_v4  ;;  %v216_v7 = vsel %vm206_vm0, %v935_v5, 0.0  ;;  %v219_v10 = vsel %vm206_vm0, %v942_v8, 0.0  ;;  %v222_v11 = vsel %vm206_vm0, %v945_v9, 0.0  ;;  %v952_v12 = vld [vmem:[%s919_s18 + $0x30] sm:$0xff]  ;;  %v955_v13 = vld [vmem:[%s919_s18 + $0x38] sm:$0xff]  ;;  %v962_v16 = vld [vmem:[%s919_s18 + $0x40] sm:$0xff] }
  0x13   : > { %v225_v14 = vsel %vm206_vm0, %v952_v12, 0.0  ;;  %v228_v15 = vsel %vm206_vm0, %v955_v13, 0.0  ;;  %v965_v17 = vld [vmem:[%s919_s18 + $0x48] sm:$0xff]  ;;  %v231_v18 = vsel %vm206_vm0, %v962_v16, 0.0  ;;  %v972_v20 = vld [vmem:[%s919_s18 + $0x50] sm:$0xff]  ;;  %v975_v21 = vld [vmem:[%s919_s18 + $0x58] sm:$0xff] }
  0x14   : > { %v234_v19 = vsel %vm206_vm0, %v965_v17, 0.0  ;;  %v237_v22 = vsel %vm206_vm0, %v972_v20, 0.0  ;;  %v240_v23 = vsel %vm206_vm0, %v975_v21, 0.0  ;;  %v982_v24 = vld [vmem:[%s919_s18 + $0x60] sm:$0xff]  ;;  %v985_v25 = vld [vmem:[%s919_s18 + $0x68] sm:$0xff]  ;;  %v992_v28 = vld [vmem:[%s919_s18 + $0x70] sm:$0xff] }
  0x15   : > { %v243_v26 = vsel %vm206_vm0, %v982_v24, 0.0  ;;  %v246_v27 = vsel %vm206_vm0, %v985_v25, 0.0  ;;  %v995_v29 = vld [vmem:[%s919_s18 + $0x78] sm:$0xff]  ;;  %v249_v30 = vsel %vm206_vm0, %v992_v28, 0.0  ;;  %v1002_v32 = vld [vmem:[%s919_s18 + $0x80] sm:$0xff]  ;;  %v1005_v33 = vld [vmem:[%s919_s18 + $0x88] sm:$0xff] }
  0x16   : > { %211 = vadd.xlane.f32.xlu0 %v210_v6  ;;  %217 = vadd.xlane.f32.xlu1 %v216_v7  ;;  %v252_v31 = vsel %vm206_vm0, %v995_v29, 0.0  ;;  %v255_v34 = vsel %vm206_vm0, %v1002_v32, 0.0  ;;  %v258_v35 = vsel %vm206_vm0, %v1005_v33, 0.0  ;;  %v1012_v36 = vld [vmem:[%s919_s18 + $0x90] sm:$0xff]  ;;  %v1015_v37 = vld [vmem:[%s919_s18 + $0x98] sm:$0xff]  ;;  %v1022_v40 = vld [vmem:[%s919_s18 + $0xa0] sm:$0xff] }
  0x17   : > { %v261_v38 = vsel %vm206_vm0, %v1012_v36, 0.0  ;;  %v264_v39 = vsel %vm206_vm0, %v1015_v37, 0.0  ;;  %v1025_v41 = vld [vmem:[%s919_s18 + $0xa8] sm:$0xff]  ;;  %v267_v42 = vsel %vm206_vm0, %v1022_v40, 0.0  ;;  %v1032_v44 = vld [vmem:[%s919_s18 + $0xb0] sm:$0xff]  ;;  %v1035_v45 = vld [vmem:[%s919_s18 + $0xb8] sm:$0xff] }
  0x18   : > { %v270_v43 = vsel %vm206_vm0, %v1025_v41, 0.0  ;;  %v273_v46 = vsel %vm206_vm0, %v1032_v44, 0.0  ;;  %v276_v47 = vsel %vm206_vm0, %v1035_v45, 0.0  ;;  %v1042_v48 = vld [vmem:[%s919_s18 + $0xc0] sm:$0xff]  ;;  %v1045_v49 = vld [vmem:[%s919_s18 + $0xc8] sm:$0xff]  ;;  %v1052_v52 = vld [vmem:[%s919_s18 + $0xd0] sm:$0xff] }
  0x19   : > { %v279_v50 = vsel %vm206_vm0, %v1042_v48, 0.0  ;;  %v282_v51 = vsel %vm206_vm0, %v1045_v49, 0.0  ;;  %v1055_v53 = vld [vmem:[%s919_s18 + $0xd8] sm:$0xff]  ;;  %v285_v54 = vsel %vm206_vm0, %v1052_v52, 0.0  ;;  %v1062_v56 = vld [vmem:[%s919_s18 + $0xe0] sm:$0xff]  ;;  %v1065_v57 = vld [vmem:[%s919_s18 + $0xe8] sm:$0xff] }
  0x1a   : > { %220 = vadd.xlane.f32.xlu0 %v219_v10  ;;  %223 = vadd.xlane.f32.xlu1 %v222_v11  ;;  %v288_v55 = vsel %vm206_vm0, %v1055_v53, 0.0  ;;  %v291_v58 = vsel %vm206_vm0, %v1062_v56, 0.0  ;;  %v294_v59 = vsel %vm206_vm0, %v1065_v57, 0.0  ;;  %v1072_v60 = vld [vmem:[%s919_s18 + $0xf0] sm:$0xff]  ;;  %v1075_v61 = vld [vmem:[%s919_s18 + $0xf8] sm:$0xff] }
  0x1b   : > { %v297_v62 = vsel %vm206_vm0, %v1072_v60, 0.0  ;;  %v300_v63 = vsel %vm206_vm0, %v1075_v61, 0.0 }
  0x1e   : > { %226 = vadd.xlane.f32.xlu0 %v225_v14  ;;  %229 = vadd.xlane.f32.xlu1 %v228_v15 }
  0x22   : > { %232 = vadd.xlane.f32.xlu0 %v231_v18  ;;  %235 = vadd.xlane.f32.xlu1 %v234_v19 }
  0x26   : > { %238 = vadd.xlane.f32.xlu0 %v237_v22  ;;  %241 = vadd.xlane.f32.xlu1 %v240_v23 }
  0x2a   : > { %244 = vadd.xlane.f32.xlu0 %v243_v26  ;;  %247 = vadd.xlane.f32.xlu1 %v246_v27 }
  0x2e   : > { %250 = vadd.xlane.f32.xlu0 %v249_v30  ;;  %253 = vadd.xlane.f32.xlu1 %v252_v31 }
  0x32   : > { %256 = vadd.xlane.f32.xlu0 %v255_v34  ;;  %259 = vadd.xlane.f32.xlu1 %v258_v35 }
  0x36   : > { %262 = vadd.xlane.f32.xlu0 %v261_v38  ;;  %265 = vadd.xlane.f32.xlu1 %v264_v39 }
  0x3a   : > { %268 = vadd.xlane.f32.xlu0 %v267_v42  ;;  %271 = vadd.xlane.f32.xlu1 %v270_v43 }
  0x3e   : > { %274 = vadd.xlane.f32.xlu0 %v273_v46  ;;  %277 = vadd.xlane.f32.xlu1 %v276_v47 }
  0x42   : > { %280 = vadd.xlane.f32.xlu0 %v279_v50  ;;  %283 = vadd.xlane.f32.xlu1 %v282_v51 }
  0x46   : > { %286 = vadd.xlane.f32.xlu0 %v285_v54  ;;  %289 = vadd.xlane.f32.xlu1 %v288_v55 }
  0x4a   : > { %292 = vadd.xlane.f32.xlu0 %v291_v58  ;;  %295 = vadd.xlane.f32.xlu1 %v294_v59 }
  0x4e   : > { %298 = vadd.xlane.f32.xlu0 %v297_v62  ;;  %301 = vadd.xlane.f32.xlu1 %v300_v63 }
  0x9f   : > { %v209_v3 = vpop.xlane.xlu0 %208  ;;  %v215_v4 = vpop.xlane.xlu1 %214 }
  0xa0   : > { %v304_v6 = vmul.f32 0.03125, %v209_v3  ;;  %v306_v7 = vmul.f32 0.03125, %v215_v4 }
  0xa2   : > { %v1082_v10 = vsub.f32 %v922_v0, %v304_v6  ;;  %v1085_v11 = vsub.f32 %v925_v1, %v306_v7 }
  0xa3   : > { %v212_v14 = vpop.xlane.xlu0 %211  ;;  %v218_v15 = vpop.xlane.xlu1 %217 }
  0xa4   : > { %v305_v18 = vmul.f32 0.03125, %v212_v14  ;;  %v307_v19 = vmul.f32 0.03125, %v218_v15  ;;  %v368_v22 = vmul.f32 %v1082_v10, %v1082_v10  ;;  %v370_v23 = vmul.f32 %v1085_v11, %v1085_v11 }
  0xa6   : > { %v1092_v26 = vsub.f32 %v928_v2, %v305_v18  ;;  %v1095_v27 = vsub.f32 %v935_v5, %v307_v19  ;;  %v400_v0 = vsel %vm206_vm0, %v368_v22, 0.0  ;;  %v406_v31 = vsel %vm206_vm0, %v370_v23, 0.0 }
  0xa7   : > { %401 = vadd.xlane.f32.xlu0 %v400_v0  ;;  %v221_v1 = vpop.xlane.xlu0 %220  ;;  %v224_v30 = vpop.xlane.xlu1 %223 }
  0xa8   : > { %v308_v34 = vmul.f32 0.03125, %v221_v1  ;;  %v309_v35 = vmul.f32 0.03125, %v224_v30  ;;  %v369_v38 = vmul.f32 %v1092_v26, %v1092_v26  ;;  %v371_v39 = vmul.f32 %v1095_v27, %v1095_v27 }
  0xaa   : > { %v1104_v2 = vsub.f32 %v942_v8, %v308_v34  ;;  %v1107_v5 = vsub.f32 %v945_v9, %v309_v35  ;;  %v403_v42 = vsel %vm206_vm0, %v369_v38, 0.0  ;;  %v409_v47 = vsel %vm206_vm0, %v371_v39, 0.0 }
  0xab   : > { %407 = vadd.xlane.f32.xlu0 %v406_v31  ;;  %404 = vadd.xlane.f32.xlu1 %v403_v42  ;;  %v227_v43 = vpop.xlane.xlu0 %226  ;;  %v230_v46 = vpop.xlane.xlu1 %229 }
  0xac   : > { %v310_v50 = vmul.f32 0.03125, %v227_v43  ;;  %v311_v51 = vmul.f32 0.03125, %v230_v46  ;;  %v372_v54 = vmul.f32 %v1104_v2, %v1104_v2  ;;  %v373_v8 = vmul.f32 %v1107_v5, %v1107_v5 }
  0xae   : > { %v1116_v55 = vsub.f32 %v952_v12, %v310_v50  ;;  %v1119_v9 = vsub.f32 %v955_v13, %v311_v51  ;;  %v412_v58 = vsel %vm206_vm0, %v372_v54, 0.0  ;;  %v415_v63 = vsel %vm206_vm0, %v373_v8, 0.0 }
  0xaf   : > { %410 = vadd.xlane.f32.xlu1 %v409_v47  ;;  %413 = vadd.xlane.f32.xlu0 %v412_v58  ;;  %v233_v59 = vpop.xlane.xlu0 %232  ;;  %v236_v62 = vpop.xlane.xlu1 %235 }
  0xb0   : > { %v312_v3 = vmul.f32 0.03125, %v233_v59  ;;  %v313_v4 = vmul.f32 0.03125, %v236_v62  ;;  %v374_v6 = vmul.f32 %v1116_v55, %v1116_v55  ;;  %v375_v12 = vmul.f32 %v1119_v9, %v1119_v9 }
  0xb2   : > { %v1128_v7 = vsub.f32 %v962_v16, %v312_v3  ;;  %v1131_v13 = vsub.f32 %v965_v17, %v313_v4  ;;  %v418_v14 = vsel %vm206_vm0, %v374_v6, 0.0  ;;  %v421_v19 = vsel %vm206_vm0, %v375_v12, 0.0 }
  0xb3   : > { %416 = vadd.xlane.f32.xlu1 %v415_v63  ;;  %419 = vadd.xlane.f32.xlu0 %v418_v14  ;;  %v239_v15 = vpop.xlane.xlu0 %238  ;;  %v242_v18 = vpop.xlane.xlu1 %241 }
  0xb4   : > { %v314_v22 = vmul.f32 0.03125, %v239_v15  ;;  %v315_v23 = vmul.f32 0.03125, %v242_v18  ;;  %v376_v0 = vmul.f32 %v1128_v7, %v1128_v7  ;;  %v377_v16 = vmul.f32 %v1131_v13, %v1131_v13 }
  0xb6   : > { %v1140_v1 = vsub.f32 %v972_v20, %v314_v22  ;;  %v1143_v17 = vsub.f32 %v975_v21, %v315_v23  ;;  %v424_v30 = vsel %vm206_vm0, %v376_v0, 0.0  ;;  %v427_v35 = vsel %vm206_vm0, %v377_v16, 0.0 }
  0xb7   : > { %422 = vadd.xlane.f32.xlu1 %v421_v19  ;;  %425 = vadd.xlane.f32.xlu0 %v424_v30  ;;  %v245_v31 = vpop.xlane.xlu0 %244  ;;  %v248_v34 = vpop.xlane.xlu1 %247 }
  0xb8   : > { %v316_v38 = vmul.f32 0.03125, %v245_v31  ;;  %v317_v39 = vmul.f32 0.03125, %v248_v34  ;;  %v378_v42 = vmul.f32 %v1140_v1, %v1140_v1  ;;  %v379_v20 = vmul.f32 %v1143_v17, %v1143_v17 }
  0xba   : > { %v1152_v43 = vsub.f32 %v982_v24, %v316_v38  ;;  %v1155_v21 = vsub.f32 %v985_v25, %v317_v39  ;;  %v430_v46 = vsel %vm206_vm0, %v378_v42, 0.0  ;;  %v433_v51 = vsel %vm206_vm0, %v379_v20, 0.0 }
  0xbb   : > { %428 = vadd.xlane.f32.xlu1 %v427_v35  ;;  %431 = vadd.xlane.f32.xlu0 %v430_v46  ;;  %v251_v47 = vpop.xlane.xlu0 %250  ;;  %v254_v50 = vpop.xlane.xlu1 %253 }
  0xbc   : > { %v318_v54 = vmul.f32 0.03125, %v251_v47  ;;  %v319_v8 = vmul.f32 0.03125, %v254_v50  ;;  %v380_v58 = vmul.f32 %v1152_v43, %v1152_v43  ;;  %v381_v24 = vmul.f32 %v1155_v21, %v1155_v21 }
  0xbe   : > { %v1164_v59 = vsub.f32 %v992_v28, %v318_v54  ;;  %v1167_v25 = vsub.f32 %v995_v29, %v319_v8  ;;  %v436_v62 = vsel %vm206_vm0, %v380_v58, 0.0  ;;  %v439_v4 = vsel %vm206_vm0, %v381_v24, 0.0 }
  0xbf   : > { %434 = vadd.xlane.f32.xlu1 %v433_v51  ;;  %437 = vadd.xlane.f32.xlu0 %v436_v62  ;;  %v257_v63 = vpop.xlane.xlu0 %256  ;;  %v260_v3 = vpop.xlane.xlu1 %259 }
  0xc0   : > { %v320_v6 = vmul.f32 0.03125, %v257_v63  ;;  %v321_v12 = vmul.f32 0.03125, %v260_v3  ;;  %v382_v14 = vmul.f32 %v1164_v59, %v1164_v59  ;;  %v383_v28 = vmul.f32 %v1167_v25, %v1167_v25 }
  0xc2   : > { %v1176_v15 = vsub.f32 %v1002_v32, %v320_v6  ;;  %v1179_v29 = vsub.f32 %v1005_v33, %v321_v12  ;;  %v442_v18 = vsel %vm206_vm0, %v382_v14, 0.0  ;;  %v445_v23 = vsel %vm206_vm0, %v383_v28, 0.0 }
  0xc3   : > { %440 = vadd.xlane.f32.xlu1 %v439_v4  ;;  %443 = vadd.xlane.f32.xlu0 %v442_v18  ;;  %v263_v19 = vpop.xlane.xlu0 %262  ;;  %v266_v22 = vpop.xlane.xlu1 %265 }
  0xc4   : > { %v322_v0 = vmul.f32 0.03125, %v263_v19  ;;  %v323_v16 = vmul.f32 0.03125, %v266_v22  ;;  %v384_v30 = vmul.f32 %v1176_v15, %v1176_v15  ;;  %v385_v32 = vmul.f32 %v1179_v29, %v1179_v29 }
  0xc6   : > { %v1188_v31 = vsub.f32 %v1012_v36, %v322_v0  ;;  %v1191_v33 = vsub.f32 %v1015_v37, %v323_v16  ;;  %v448_v34 = vsel %vm206_vm0, %v384_v30, 0.0  ;;  %v451_v39 = vsel %vm206_vm0, %v385_v32, 0.0 }
  0xc7   : > { %446 = vadd.xlane.f32.xlu1 %v445_v23  ;;  %449 = vadd.xlane.f32.xlu0 %v448_v34  ;;  %v269_v35 = vpop.xlane.xlu0 %268  ;;  %v272_v38 = vpop.xlane.xlu1 %271 }
  0xc8   : > { %v324_v42 = vmul.f32 0.03125, %v269_v35  ;;  %v325_v20 = vmul.f32 0.03125, %v272_v38  ;;  %v386_v46 = vmul.f32 %v1188_v31, %v1188_v31  ;;  %v387_v36 = vmul.f32 %v1191_v33, %v1191_v33 }
  0xca   : > { %v1200_v47 = vsub.f32 %v1022_v40, %v324_v42  ;;  %v1203_v37 = vsub.f32 %v1025_v41, %v325_v20  ;;  %v454_v50 = vsel %vm206_vm0, %v386_v46, 0.0  ;;  %v457_v8 = vsel %vm206_vm0, %v387_v36, 0.0 }
  0xcb   : > { %452 = vadd.xlane.f32.xlu1 %v451_v39  ;;  %455 = vadd.xlane.f32.xlu0 %v454_v50  ;;  %v275_v51 = vpop.xlane.xlu0 %274  ;;  %v278_v54 = vpop.xlane.xlu1 %277 }
  0xcc   : > { %v326_v58 = vmul.f32 0.03125, %v275_v51  ;;  %v327_v24 = vmul.f32 0.03125, %v278_v54  ;;  %v388_v62 = vmul.f32 %v1200_v47, %v1200_v47  ;;  %v389_v40 = vmul.f32 %v1203_v37, %v1203_v37 }
  0xce   : > { %v1212_v63 = vsub.f32 %v1032_v44, %v326_v58  ;;  %v1215_v41 = vsub.f32 %v1035_v45, %v327_v24  ;;  %v460_v3 = vsel %vm206_vm0, %v388_v62, 0.0  ;;  %v463_v12 = vsel %vm206_vm0, %v389_v40, 0.0 }
  0xcf   : > { %458 = vadd.xlane.f32.xlu1 %v457_v8  ;;  %461 = vadd.xlane.f32.xlu0 %v460_v3  ;;  %v281_v4 = vpop.xlane.xlu0 %280  ;;  %v284_v6 = vpop.xlane.xlu1 %283 }
  0xd0   : > { %v328_v14 = vmul.f32 0.03125, %v281_v4  ;;  %v329_v28 = vmul.f32 0.03125, %v284_v6  ;;  %v390_v18 = vmul.f32 %v1212_v63, %v1212_v63  ;;  %v391_v44 = vmul.f32 %v1215_v41, %v1215_v41 }
  0xd2   : > { %v1224_v19 = vsub.f32 %v1042_v48, %v328_v14  ;;  %v1227_v45 = vsub.f32 %v1045_v49, %v329_v28  ;;  %v466_v22 = vsel %vm206_vm0, %v390_v18, 0.0  ;;  %v469_v16 = vsel %vm206_vm0, %v391_v44, 0.0 }
  0xd3   : > { %464 = vadd.xlane.f32.xlu1 %v463_v12  ;;  %467 = vadd.xlane.f32.xlu0 %v466_v22  ;;  %v287_v23 = vpop.xlane.xlu0 %286  ;;  %v290_v0 = vpop.xlane.xlu1 %289 }
  0xd4   : > { %v330_v30 = vmul.f32 0.03125, %v287_v23  ;;  %v331_v32 = vmul.f32 0.03125, %v290_v0  ;;  %v392_v34 = vmul.f32 %v1224_v19, %v1224_v19  ;;  %v393_v48 = vmul.f32 %v1227_v45, %v1227_v45 }
  0xd6   : > { %v1236_v35 = vsub.f32 %v1052_v52, %v330_v30  ;;  %v1239_v49 = vsub.f32 %v1055_v53, %v331_v32  ;;  %v472_v38 = vsel %vm206_vm0, %v392_v34, 0.0  ;;  %v475_v20 = vsel %vm206_vm0, %v393_v48, 0.0 }
  0xd7   : > { %470 = vadd.xlane.f32.xlu1 %v469_v16  ;;  %473 = vadd.xlane.f32.xlu0 %v472_v38  ;;  %v293_v39 = vpop.xlane.xlu0 %292  ;;  %v296_v42 = vpop.xlane.xlu1 %295 }
  0xd8   : > { %v332_v46 = vmul.f32 0.03125, %v293_v39  ;;  %v333_v36 = vmul.f32 0.03125, %v296_v42  ;;  %v394_v50 = vmul.f32 %v1236_v35, %v1236_v35  ;;  %v395_v52 = vmul.f32 %v1239_v49, %v1239_v49 }
  0xda   : > { %v1248_v51 = vsub.f32 %v1062_v56, %v332_v46  ;;  %v1251_v53 = vsub.f32 %v1065_v57, %v333_v36  ;;  %v478_v54 = vsel %vm206_vm0, %v394_v50, 0.0  ;;  %v481_v24 = vsel %vm206_vm0, %v395_v52, 0.0 }
  0xdb   : > { %476 = vadd.xlane.f32.xlu1 %v475_v20  ;;  %479 = vadd.xlane.f32.xlu0 %v478_v54  ;;  %v299_v8 = vpop.xlane.xlu0 %298  ;;  %v302_v58 = vpop.xlane.xlu1 %301 }
  0xdc   : > { %v334_v62 = vmul.f32 0.03125, %v299_v8  ;;  %v335_v40 = vmul.f32 0.03125, %v302_v58  ;;  %v396_v3 = vmul.f32 %v1248_v51, %v1248_v51  ;;  %v397_v56 = vmul.f32 %v1251_v53, %v1251_v53  ;;  %v1276_v58 = vld [vmem:[%s1454_s1] ss:$0 sm:$0xff] }
  0xde   : > { %v1260_v4 = vsub.f32 %v1072_v60, %v334_v62  ;;  %v1263_v57 = vsub.f32 %v1075_v61, %v335_v40  ;;  %v484_v6 = vsel %vm206_vm0, %v396_v3, 0.0  ;;  %v487_v12 = vsel %vm206_vm0, %v397_v56, 0.0 }
  0xdf   : > { %482 = vadd.xlane.f32.xlu1 %v481_v24  ;;  %485 = vadd.xlane.f32.xlu0 %v484_v6  ;;  %v1282_v6 = vld [vmem:[%s1455_s2] ss:$0 sm:$0xff] }
  0xe0   : > { %v398_v14 = vmul.f32 %v1260_v4, %v1260_v4  ;;  %v399_v28 = vmul.f32 %v1263_v57, %v1263_v57 }
  0xe2   : > { %v490_v18 = vsel %vm206_vm0, %v398_v14, 0.0  ;;  %v493_v60 = vsel %vm206_vm0, %v399_v28, 0.0 }
  0xe3   : > { %488 = vadd.xlane.f32.xlu1 %v487_v12  ;;  %491 = vadd.xlane.f32.xlu0 %v490_v18 }
  0xe7   : > { %494 = vadd.xlane.f32.xlu1 %v493_v60 }
 0x134   : > { %v402_v61 = vpop.xlane.xlu0 %401 }
 0x135   : > { %v496_v44 = vmul.f32 0.03125, %v402_v61 }
 0x137   : > { %v528_v22 = vadd.f32 1e-06, %v496_v44 }
 0x138   : > { %v405_v23 = vpop.xlane.xlu1 %404  ;;  %v408_v0 = vpop.xlane.xlu0 %407 }
 0x139   : > { %811 = vrsqrt.f32 %v528_v22  ;;  %v497_v16 = vmul.f32 0.03125, %v405_v23  ;;  %v498_v30 = vmul.f32 0.03125, %v408_v0 }
 0x13b   : > { %v529_v32 = vadd.f32 1e-06, %v497_v16  ;;  %v530_v34 = vadd.f32 1e-06, %v498_v30 }
 0x13c   : > { %v411_v48 = vpop.xlane.xlu1 %410  ;;  %v414_v38 = vpop.xlane.xlu0 %413 }
 0x13d   : > { %813 = vrsqrt.f32 %v529_v32  ;;  %v499_v39 = vmul.f32 0.03125, %v411_v48  ;;  %v500_v42 = vmul.f32 0.03125, %v414_v38 }
 0x13e   : > { %815 = vrsqrt.f32 %v530_v34 }
 0x13f   : > { %v531_v20 = vadd.f32 1e-06, %v499_v39  ;;  %v532_v46 = vadd.f32 1e-06, %v500_v42 }
 0x140   : > { %v417_v36 = vpop.xlane.xlu1 %416  ;;  %v420_v50 = vpop.xlane.xlu0 %419 }
 0x141   : > { %817 = vrsqrt.f32 %v531_v20  ;;  %v501_v52 = vmul.f32 0.03125, %v417_v36  ;;  %v502_v54 = vmul.f32 0.03125, %v420_v50 }
 0x142   : > { %819 = vrsqrt.f32 %v532_v46 }
 0x143   : > { %v812_v8 = vpop.eup %811  ;;  %v533_v24 = vadd.f32 1e-06, %v501_v52  ;;  %v534_v62 = vadd.f32 1e-06, %v502_v54 }
 0x144   : > { %v592_v40 = vmul.f32 %v812_v8, %v1082_v10  ;;  %v423_v3 = vpop.xlane.xlu1 %422  ;;  %v426_v56 = vpop.xlane.xlu0 %425 }
 0x145   : > { %821 = vrsqrt.f32 %v533_v24  ;;  %v503_v12 = vmul.f32 0.03125, %v423_v3  ;;  %v504_v14 = vmul.f32 0.03125, %v426_v56 }
 0x146   : > { %v631_v28 = vmul.f32 %v1276_v58, %v592_v40  ;;  %823 = vrsqrt.f32 %v534_v62 }
 0x147   : > { %v814_v18 = vpop.eup %813  ;;  %v535_v10 = vadd.f32 1e-06, %v503_v12  ;;  %v536_v60 = vadd.f32 1e-06, %v504_v14 }
 0x148   : > { %v816_v61 = vpop.eup %815  ;;  %v670_v44 = vadd.f32 %v1282_v6, %v631_v28  ;;  %v593_v22 = vmul.f32 %v814_v18, %v1092_v26  ;;  %v429_v23 = vpop.xlane.xlu1 %428 }
 0x149   : > { %v432_v0 = vpop.xlane.xlu0 %431  ;;  %v594_v16 = vmul.f32 %v816_v61, %v1085_v11  ;;  %825 = vrsqrt.f32 %v535_v10  ;;  %v505_v30 = vmul.f32 0.03125, %v429_v23 }
 0x14a   : > { %v506_v32 = vmul.f32 0.03125, %v432_v0  ;;  %702 = vst.msk [vmem:[%s1290_s25] sm:$0xff] %vm206_vm0, %v670_v44  ;;  %v632_v34 = vmul.f32 %v1276_v58, %v593_v22  ;;  %827 = vrsqrt.f32 %v536_v60 }
 0x14b   : > { %v818_v48 = vpop.eup %817  ;;  %v633_v38 = vmul.f32 %v1276_v58, %v594_v16  ;;  %v537_v39 = vadd.f32 1e-06, %v505_v30 }
 0x14c   : > { %v538_v42 = vadd.f32 1e-06, %v506_v32  ;;  %v820_v26 = vpop.eup %819  ;;  %v671_v20 = vadd.f32 %v1282_v6, %v632_v34  ;;  %v595_v11 = vmul.f32 %v818_v48, %v1095_v27  ;;  %v435_v46 = vpop.xlane.xlu1 %434 }
 0x14d   : > { %v438_v36 = vpop.xlane.xlu0 %437  ;;  %v672_v50 = vadd.f32 %v1282_v6, %v633_v38  ;;  %v596_v52 = vmul.f32 %v820_v26, %v1104_v2  ;;  %829 = vrsqrt.f32 %v537_v39  ;;  %v507_v54 = vmul.f32 0.03125, %v435_v46 }
 0x14e   : > { %703 = vst.msk [vmem:[%s1290_s25 + $0x8] sm:$0xff] %vm206_vm0, %v671_v20  ;;  %v634_v8 = vmul.f32 %v1276_v58, %v595_v11  ;;  %831 = vrsqrt.f32 %v538_v42  ;;  %v508_v24 = vmul.f32 0.03125, %v438_v36 }
 0x14f   : > { %v822_v62 = vpop.eup %821  ;;  %704 = vst.msk [vmem:[%s1290_s25 + $0x10] sm:$0xff] %vm206_vm0, %v672_v50  ;;  %v635_v27 = vmul.f32 %v1276_v58, %v596_v52  ;;  %v539_v40 = vadd.f32 1e-06, %v507_v54 }
 0x150   : > { %v824_v3 = vpop.eup %823  ;;  %v673_v56 = vadd.f32 %v1282_v6, %v634_v8  ;;  %v597_v2 = vmul.f32 %v822_v62, %v1107_v5  ;;  %v540_v12 = vadd.f32 1e-06, %v508_v24  ;;  %v441_v14 = vpop.xlane.xlu1 %440 }
 0x151   : > { %v444_v28 = vpop.xlane.xlu0 %443  ;;  %v674_v18 = vadd.f32 %v1282_v6, %v635_v27  ;;  %v598_v10 = vmul.f32 %v824_v3, %v1116_v55  ;;  %833 = vrsqrt.f32 %v539_v40  ;;  %v509_v60 = vmul.f32 0.03125, %v441_v14 }
 0x152   : > { %705 = vst.msk [vmem:[%s1290_s25 + $0x18] sm:$0xff] %vm206_vm0, %v673_v56  ;;  %v636_v61 = vmul.f32 %v1276_v58, %v597_v2  ;;  %835 = vrsqrt.f32 %v540_v12  ;;  %v510_v44 = vmul.f32 0.03125, %v444_v28 }
 0x153   : > { %v826_v22 = vpop.eup %825  ;;  %706 = vst.msk [vmem:[%s1290_s25 + $0x20] sm:$0xff] %vm206_vm0, %v674_v18  ;;  %v637_v5 = vmul.f32 %v1276_v58, %v598_v10  ;;  %v541_v23 = vadd.f32 1e-06, %v509_v60 }
 0x154   : > { %v828_v0 = vpop.eup %827  ;;  %v675_v16 = vadd.f32 %v1282_v6, %v636_v61  ;;  %v599_v55 = vmul.f32 %v826_v22, %v1119_v9  ;;  %v542_v30 = vadd.f32 1e-06, %v510_v44  ;;  %v447_v32 = vpop.xlane.xlu1 %446 }
 0x155   : > { %v450_v34 = vpop.xlane.xlu0 %449  ;;  %v676_v48 = vadd.f32 %v1282_v6, %v637_v5  ;;  %v600_v38 = vmul.f32 %v828_v0, %v1128_v7  ;;  %837 = vrsqrt.f32 %v541_v23  ;;  %v511_v39 = vmul.f32 0.03125, %v447_v32 }
 0x156   : > { %707 = vst.msk [vmem:[%s1290_s25 + $0x28] sm:$0xff] %vm206_vm0, %v675_v16  ;;  %v638_v42 = vmul.f32 %v1276_v58, %v599_v55  ;;  %839 = vrsqrt.f32 %v542_v30  ;;  %v512_v26 = vmul.f32 0.03125, %v450_v34 }
 0x157   : > { %v830_v20 = vpop.eup %829  ;;  %708 = vst.msk [vmem:[%s1290_s25 + $0x30] sm:$0xff] %vm206_vm0, %v676_v48  ;;  %v639_v9 = vmul.f32 %v1276_v58, %v600_v38  ;;  %v543_v11 = vadd.f32 1e-06, %v511_v39 }
 0x158   : > { %v832_v46 = vpop.eup %831  ;;  %v677_v36 = vadd.f32 %v1282_v6, %v638_v42  ;;  %v601_v7 = vmul.f32 %v830_v20, %v1131_v13  ;;  %v544_v50 = vadd.f32 1e-06, %v512_v26  ;;  %v453_v52 = vpop.xlane.xlu1 %452 }
 0x159   : > { %v456_v54 = vpop.xlane.xlu0 %455  ;;  %v678_v8 = vadd.f32 %v1282_v6, %v639_v9  ;;  %v602_v24 = vmul.f32 %v832_v46, %v1140_v1  ;;  %841 = vrsqrt.f32 %v543_v11  ;;  %v513_v62 = vmul.f32 0.03125, %v453_v52 }
 0x15a   : > { %709 = vst.msk [vmem:[%s1290_s25 + $0x38] sm:$0xff] %vm206_vm0, %v677_v36  ;;  %v640_v27 = vmul.f32 %v1276_v58, %v601_v7  ;;  %843 = vrsqrt.f32 %v544_v50  ;;  %v514_v40 = vmul.f32 0.03125, %v456_v54 }
 0x15b   : > { %v834_v3 = vpop.eup %833  ;;  %710 = vst.msk [vmem:[%s1290_s25 + $0x40] sm:$0xff] %vm206_vm0, %v678_v8  ;;  %v641_v13 = vmul.f32 %v1276_v58, %v602_v24  ;;  %v545_v56 = vadd.f32 1e-06, %v513_v62 }
 0x15c   : > { %v836_v2 = vpop.eup %835  ;;  %v679_v12 = vadd.f32 %v1282_v6, %v640_v27  ;;  %v603_v1 = vmul.f32 %v834_v3, %v1143_v17  ;;  %v546_v14 = vadd.f32 1e-06, %v514_v40  ;;  %v459_v28 = vpop.xlane.xlu1 %458 }
 0x15d   : > { %v462_v18 = vpop.xlane.xlu0 %461  ;;  %v680_v10 = vadd.f32 %v1282_v6, %v641_v13  ;;  %v604_v60 = vmul.f32 %v836_v2, %v1152_v43  ;;  %845 = vrsqrt.f32 %v545_v56  ;;  %v515_v61 = vmul.f32 0.03125, %v459_v28 }
 0x15e   : > { %711 = vst.msk [vmem:[%s1290_s25 + $0x48] sm:$0xff] %vm206_vm0, %v679_v12  ;;  %v642_v44 = vmul.f32 %v1276_v58, %v603_v1  ;;  %847 = vrsqrt.f32 %v546_v14  ;;  %v516_v22 = vmul.f32 0.03125, %v462_v18 }
 0x15f   : > { %v838_v5 = vpop.eup %837  ;;  %712 = vst.msk [vmem:[%s1290_s25 + $0x50] sm:$0xff] %vm206_vm0, %v680_v10  ;;  %v643_v17 = vmul.f32 %v1276_v58, %v604_v60  ;;  %v547_v23 = vadd.f32 1e-06, %v515_v61 }
 0x160   : > { %v840_v0 = vpop.eup %839  ;;  %v681_v16 = vadd.f32 %v1282_v6, %v642_v44  ;;  %v605_v43 = vmul.f32 %v838_v5, %v1155_v21  ;;  %v548_v55 = vadd.f32 1e-06, %v516_v22  ;;  %v465_v30 = vpop.xlane.xlu1 %464 }
 0x161   : > { %v468_v32 = vpop.xlane.xlu0 %467  ;;  %v682_v34 = vadd.f32 %v1282_v6, %v643_v17  ;;  %v606_v48 = vmul.f32 %v840_v0, %v1164_v59  ;;  %849 = vrsqrt.f32 %v547_v23  ;;  %v517_v38 = vmul.f32 0.03125, %v465_v30 }
 0x162   : > { %713 = vst.msk [vmem:[%s1290_s25 + $0x58] sm:$0xff] %vm206_vm0, %v681_v16  ;;  %v644_v39 = vmul.f32 %v1276_v58, %v605_v43  ;;  %851 = vrsqrt.f32 %v548_v55  ;;  %v518_v42 = vmul.f32 0.03125, %v468_v32 }
 0x163   : > { %v842_v26 = vpop.eup %841  ;;  %714 = vst.msk [vmem:[%s1290_s25 + $0x60] sm:$0xff] %vm206_vm0, %v682_v34  ;;  %v645_v21 = vmul.f32 %v1276_v58, %v606_v48  ;;  %v549_v20 = vadd.f32 1e-06, %v517_v38 }
 0x164   : > { %v844_v9 = vpop.eup %843  ;;  %v683_v11 = vadd.f32 %v1282_v6, %v644_v39  ;;  %v607_v59 = vmul.f32 %v842_v26, %v1167_v25  ;;  %v550_v46 = vadd.f32 1e-06, %v518_v42  ;;  %v471_v36 = vpop.xlane.xlu1 %470 }
 0x165   : > { %v474_v7 = vpop.xlane.xlu0 %473  ;;  %v684_v50 = vadd.f32 %v1282_v6, %v645_v21  ;;  %v608_v52 = vmul.f32 %v844_v9, %v1176_v15  ;;  %853 = vrsqrt.f32 %v549_v20  ;;  %v519_v54 = vmul.f32 0.03125, %v471_v36 }
 0x166   : > { %715 = vst.msk [vmem:[%s1290_s25 + $0x68] sm:$0xff] %vm206_vm0, %v683_v11  ;;  %v646_v8 = vmul.f32 %v1276_v58, %v607_v59  ;;  %855 = vrsqrt.f32 %v550_v46  ;;  %v520_v24 = vmul.f32 0.03125, %v474_v7 }
 0x167   : > { %v846_v62 = vpop.eup %845  ;;  %716 = vst.msk [vmem:[%s1290_s25 + $0x70] sm:$0xff] %vm206_vm0, %v684_v50  ;;  %v647_v25 = vmul.f32 %v1276_v58, %v608_v52  ;;  %v551_v27 = vadd.f32 1e-06, %v519_v54 }
 0x168   : > { %v848_v40 = vpop.eup %847  ;;  %v685_v3 = vadd.f32 %v1282_v6, %v646_v8  ;;  %v609_v15 = vmul.f32 %v846_v62, %v1179_v29  ;;  %v552_v13 = vadd.f32 1e-06, %v520_v24  ;;  %v477_v56 = vpop.xlane.xlu1 %476 }
 0x169   : > { %v480_v2 = vpop.xlane.xlu0 %479  ;;  %v686_v12 = vadd.f32 %v1282_v6, %v647_v25  ;;  %v610_v1 = vmul.f32 %v848_v40, %v1188_v31  ;;  %857 = vrsqrt.f32 %v551_v27  ;;  %v521_v14 = vmul.f32 0.03125, %v477_v56 }
 0x16a   : > { %717 = vst.msk [vmem:[%s1290_s25 + $0x78] sm:$0xff] %vm206_vm0, %v685_v3  ;;  %v648_v28 = vmul.f32 %v1276_v58, %v609_v15  ;;  %859 = vrsqrt.f32 %v552_v13  ;;  %v522_v18 = vmul.f32 0.03125, %v480_v2 }
 0x16b   : > { %v850_v10 = vpop.eup %849  ;;  %718 = vst.msk [vmem:[%s1290_s25 + $0x80] sm:$0xff] %vm206_vm0, %v686_v12  ;;  %v649_v29 = vmul.f32 %v1276_v58, %v610_v1  ;;  %v553_v60 = vadd.f32 1e-06, %v521_v14 }
 0x16c   : > { %v852_v61 = vpop.eup %851  ;;  %v687_v44 = vadd.f32 %v1282_v6, %v648_v28  ;;  %v611_v31 = vmul.f32 %v850_v10, %v1191_v33  ;;  %v554_v22 = vadd.f32 1e-06, %v522_v18  ;;  %v483_v5 = vpop.xlane.xlu1 %482 }
 0x16d   : > { %v486_v17 = vpop.xlane.xlu0 %485  ;;  %v688_v23 = vadd.f32 %v1282_v6, %v649_v29  ;;  %v612_v0 = vmul.f32 %v852_v61, %v1200_v47  ;;  %861 = vrsqrt.f32 %v553_v60  ;;  %v523_v16 = vmul.f32 0.03125, %v483_v5 }
 0x16e   : > { %719 = vst.msk [vmem:[%s1290_s25 + $0x88] sm:$0xff] %vm206_vm0, %v687_v44  ;;  %v650_v43 = vmul.f32 %v1276_v58, %v611_v31  ;;  %863 = vrsqrt.f32 %v554_v22  ;;  %v524_v55 = vmul.f32 0.03125, %v486_v17 }
 0x16f   : > { %v854_v30 = vpop.eup %853  ;;  %720 = vst.msk [vmem:[%s1290_s25 + $0x90] sm:$0xff] %vm206_vm0, %v688_v23  ;;  %v651_v33 = vmul.f32 %v1276_v58, %v612_v0  ;;  %v555_v32 = vadd.f32 1e-06, %v523_v16 }
 0x170   : > { %v856_v34 = vpop.eup %855  ;;  %v689_v48 = vadd.f32 %v1282_v6, %v650_v43  ;;  %v613_v47 = vmul.f32 %v854_v30, %v1203_v37  ;;  %v556_v38 = vadd.f32 1e-06, %v524_v55  ;;  %v489_v39 = vpop.xlane.xlu1 %488 }
 0x171   : > { %v492_v42 = vpop.xlane.xlu0 %491  ;;  %v690_v26 = vadd.f32 %v1282_v6, %v651_v33  ;;  %v614_v21 = vmul.f32 %v856_v34, %v1212_v63  ;;  %865 = vrsqrt.f32 %v555_v32  ;;  %v525_v20 = vmul.f32 0.03125, %v489_v39 }
 0x172   : > { %721 = vst.msk [vmem:[%s1290_s25 + $0x98] sm:$0xff] %vm206_vm0, %v689_v48  ;;  %v652_v9 = vmul.f32 %v1276_v58, %v613_v47  ;;  %867 = vrsqrt.f32 %v556_v38  ;;  %v526_v11 = vmul.f32 0.03125, %v492_v42 }
 0x173   : > { %v858_v59 = vpop.eup %857  ;;  %722 = vst.msk [vmem:[%s1290_s25 + $0xa0] sm:$0xff] %vm206_vm0, %v690_v26  ;;  %v653_v37 = vmul.f32 %v1276_v58, %v614_v21  ;;  %v557_v46 = vadd.f32 1e-06, %v525_v20 }
 0x174   : > { %v860_v36 = vpop.eup %859  ;;  %v691_v7 = vadd.f32 %v1282_v6, %v652_v9  ;;  %v615_v63 = vmul.f32 %v858_v59, %v1215_v41  ;;  %v558_v50 = vadd.f32 1e-06, %v526_v11  ;;  %v495_v52 = vpop.xlane.xlu1 %494 }
 0x175   : > { %v692_v54 = vadd.f32 %v1282_v6, %v653_v37  ;;  %v616_v8 = vmul.f32 %v860_v36, %v1224_v19  ;;  %869 = vrsqrt.f32 %v557_v46  ;;  %v527_v24 = vmul.f32 0.03125, %v495_v52 }
 0x176   : > { %723 = vst.msk [vmem:[%s1290_s25 + $0xa8] sm:$0xff] %vm206_vm0, %v691_v7  ;;  %v654_v62 = vmul.f32 %v1276_v58, %v615_v63  ;;  %871 = vrsqrt.f32 %v558_v50 }
 0x177   : > { %v862_v25 = vpop.eup %861  ;;  %724 = vst.msk [vmem:[%s1290_s25 + $0xb0] sm:$0xff] %vm206_vm0, %v692_v54  ;;  %v655_v41 = vmul.f32 %v1276_v58, %v616_v8  ;;  %v559_v27 = vadd.f32 1e-06, %v527_v24 }
 0x178   : > { %v864_v40 = vpop.eup %863  ;;  %v693_v3 = vadd.f32 %v1282_v6, %v654_v62  ;;  %v617_v19 = vmul.f32 %v862_v25, %v1227_v45 }
 0x179   : > { %v694_v15 = vadd.f32 %v1282_v6, %v655_v41  ;;  %v618_v13 = vmul.f32 %v864_v40, %v1236_v35  ;;  %873 = vrsqrt.f32 %v559_v27 }
 0x17a   : > { %725 = vst.msk [vmem:[%s1290_s25 + $0xb8] sm:$0xff] %vm206_vm0, %v693_v3  ;;  %v656_v56 = vmul.f32 %v1276_v58, %v617_v19 }
 0x17b   : > { %v866_v2 = vpop.eup %865  ;;  %726 = vst.msk [vmem:[%s1290_s25 + $0xc0] sm:$0xff] %vm206_vm0, %v694_v15  ;;  %v657_v12 = vmul.f32 %v1276_v58, %v618_v13 }
 0x17c   : > { %v868_v1 = vpop.eup %867  ;;  %v695_v14 = vadd.f32 %v1282_v6, %v656_v56  ;;  %v619_v45 = vmul.f32 %v866_v2, %v1239_v49 }
 0x17d   : > { %v696_v28 = vadd.f32 %v1282_v6, %v657_v12  ;;  %v620_v35 = vmul.f32 %v868_v1, %v1248_v51 }
 0x17e   : > { %727 = vst.msk [vmem:[%s1290_s25 + $0xc8] sm:$0xff] %vm206_vm0, %v695_v14  ;;  %v658_v18 = vmul.f32 %v1276_v58, %v619_v45 }
 0x17f   : > { %v870_v10 = vpop.eup %869  ;;  %728 = vst.msk [vmem:[%s1290_s25 + $0xd0] sm:$0xff] %vm206_vm0, %v696_v28  ;;  %v659_v29 = vmul.f32 %v1276_v58, %v620_v35 }
 0x180   : > { %v872_v60 = vpop.eup %871  ;;  %v697_v61 = vadd.f32 %v1282_v6, %v658_v18  ;;  %v621_v49 = vmul.f32 %v870_v10, %v1251_v53 }
 0x181   : > { %v698_v44 = vadd.f32 %v1282_v6, %v659_v29  ;;  %v622_v51 = vmul.f32 %v872_v60, %v1260_v4 }
 0x182   : > { %729 = vst.msk [vmem:[%s1290_s25 + $0xd8] sm:$0xff] %vm206_vm0, %v697_v61  ;;  %v660_v31 = vmul.f32 %v1276_v58, %v621_v49 }
 0x183   : > { %v874_v22 = vpop.eup %873  ;;  %730 = vst.msk [vmem:[%s1290_s25 + $0xe0] sm:$0xff] %vm206_vm0, %v698_v44  ;;  %v661_v5 = vmul.f32 %v1276_v58, %v622_v51 }
 0x184   : > { %v699_v17 = vadd.f32 %v1282_v6, %v660_v31  ;;  %v623_v23 = vmul.f32 %v874_v22, %v1263_v57 }
 0x185   : > { %v700_v0 = vadd.f32 %v1282_v6, %v661_v5 }
 0x186   : > { %731 = vst.msk [vmem:[%s1290_s25 + $0xe8] sm:$0xff] %vm206_vm0, %v699_v17  ;;  %v662_v53 = vmul.f32 %v1276_v58, %v623_v23 }
 0x187   : > { %732 = vst.msk [vmem:[%s1290_s25 + $0xf0] sm:$0xff] %vm206_vm0, %v700_v0 }
 0x188   : > { %v701_v4 = vadd.f32 %v1282_v6, %v662_v53 }
 0x18a   : > { %733 = vst.msk [vmem:[%s1290_s25 + $0xf8] sm:$0xff] %vm206_vm0, %v701_v4 }
 0x18b PF: > { %s13_s12 = sadd.s32 1, %s881_s12  }
 0x18c   : > { %p10_p4 = scmp.ge.s32.totalorder %s13_s12, 4  }
 0x18e   :  { %12 = sbr.rel (!%p10_p4) target bundleno = 1 (0x1), region = 62 }

</bundles_post_ra>
